<compile_context>
chip_gen: v7x
topology: tpu7x:2x2x1
jax: 0.10.0
libtpu: 0.0.40
codegen_flags: <defaults>
</compile_context>

<pallas_src>
import functools
import math

import jax
import jax.numpy as jnp
from jax import lax
from jax.experimental import pallas as pl
from jax.experimental.pallas import tpu as pltpu


def _round_up(x, m):
    return ((x + m - 1) // m) * m


def _backbone_update_kernel(s_ref, w_ref, b_ref, o_ref):
    # s_ref: (TM, c_s)  compute dtype
    # w_ref: (6, c_s)   compute dtype (resident)
    # b_ref: (6, 1)     f32           (resident)
    # o_ref: (6, TM)    f32           (lane-dense store)
    acc = lax.dot_general(
        w_ref[...],
        s_ref[...],
        dimension_numbers=(((1,), (1,)), ((), ())),   # contract c_s on both
        preferred_element_type=jnp.float32,
    )
    o_ref[...] = (acc + b_ref[...]).astype(o_ref.dtype)


@functools.partial(
    jax.jit, static_argnames=("block_rows", "compute_dtype", "out_dtype")
)
def backbone_update(
    s,
    weight,
    bias,
    *,
    block_rows=4096,
    compute_dtype=None,
    out_dtype=jnp.float32,
):
    """Affine projection s[..., c_s] -> [..., 6] (OpenFold BackboneUpdate).

    Args:
      s:      [..., c_s].
      weight: [6, c_s]   (torch nn.Linear layout, NOT transposed).
      bias:   [6].
      block_rows: row tile target.  Suggested: 2048-4096 (v5e), 4096-8192
        (v6e), 8192 f32 / 16384 bf16 (v7x).  Rounded down to a multiple of 128.
      compute_dtype: dtype s and weight are cast to before the kernel
        (e.g. jnp.bfloat16 to halve HBM read traffic).  Default: s.dtype.
      out_dtype: output dtype (f32 by default; output bytes are negligible).
    """
    *lead, c_s = s.shape
    n = math.prod(lead) if lead else 1

    cdt = jnp.dtype(compute_dtype) if compute_dtype is not None else jnp.dtype(s.dtype)
    s2d = s.reshape(n, c_s).astype(cdt)
    w = weight.astype(cdt)                      # keep MXU on native cdt x cdt -> f32
    b2d = bias.reshape(6, 1).astype(jnp.float32)

    # ---- Row tile selection -------------------------------------------------
    # TM is the lane dim of the (6, TM) output block: for multi-tile grids it
    # MUST be a multiple of 128 (lane-dense stores + (8,128) rule).  A single
    # full-array tile is only used for tiny inputs; otherwise we force >= 2
    # grid steps so the "parallel" axis gives v7x's second TC work.
    if n <= 256:
        tm = n                                  # single tile == full array: rule exempt
    else:
        want = max(128, (block_rows // 128) * 128)
        half = _round_up(pl.cdiv(n, 2), 128)    # at least 2 grid steps
        tm = min(want, half)
    grid = (pl.cdiv(n, tm),)

    # ---- VMEM budget derived from the tile (double-buffered in/out + slack) --
    itemsize = cdt.itemsize
    vmem_bytes = (
        2 * tm * c_s * itemsize                 # s tiles (double-buffered)
        + 2 * 6 * tm * 4                        # f32 out tiles (double-buffered)
        + 2 * (6 * c_s * itemsize + 6 * 4)      # resident weight + bias
        + (4 << 20)                             # slack
    )
    vmem_limit = int(min(max(vmem_bytes, 16 << 20), 48 << 20))

    cost = pl.CostEstimate(
        flops=2 * 6 * n * c_s,
        transcendentals=0,
        bytes_accessed=n * c_s * itemsize + 6 * c_s * itemsize + 6 * 4 + 6 * n * 4,
    )

    out_t = pl.pallas_call(
        _backbone_update_kernel,
        out_shape=jax.ShapeDtypeStruct((6, n), out_dtype),
        grid=grid,
        in_specs=[
            pl.BlockSpec((tm, c_s), lambda i: (i, 0)),   # s rows: streamed
            pl.BlockSpec((6, c_s), lambda i: (0, 0)),    # weight: resident
            pl.BlockSpec((6, 1), lambda i: (0, 0)),      # bias:   resident
        ],
        out_specs=pl.BlockSpec((6, tm), lambda i: (0, i)),  # lane-dense store
        compiler_params=pltpu.CompilerParams(
            dimension_semantics=("parallel",),           # row tiles independent
            vmem_limit_bytes=vmem_limit,
        ),
        cost_estimate=cost,
    )(s2d, w, b2d)

    # Tiny [6, N] -> [N, 6] transpose outside the kernel (negligible traffic).
    # TODO(synk): downstream rigid/quaternion construction could consume the
    # (6, N) layout directly and fold this transpose away entirely.
    return out_t.T.reshape(*lead, 6)


if __name__ == "__main__":
    # --- Test 1: small shapes consistent with the module (batch=2, seq=8). ---
    batch, seq, c_s = 2, 8, 32

    key = jax.random.PRNGKey(0)
    k_s, k_w, k_b = jax.random.split(key, 3)

    s = jax.random.normal(k_s, (batch, seq, c_s), dtype=jnp.float32)
    # NOTE: OpenFold's init='final' zero-initializes the weights; random values
    # here so the matmul path is actually exercised.  Torch layout [6, c_s].
    weight = 0.02 * jax.random.normal(k_w, (6, c_s), dtype=jnp.float32)
    bias = 0.01 * jax.random.normal(k_b, (6,), dtype=jnp.float32)

    out = jax.block_until_ready(backbone_update(s, weight, bias))
    ref = s @ weight.T + bias
    assert out.shape == (batch, seq, 6), out.shape
    assert out.dtype == jnp.float32, out.dtype
    assert jnp.allclose(out, ref, atol=1e-5, rtol=1e-5), "mismatch vs reference"

    # --- Test 2: multi-tile grid with ragged last tile (600 rows, TM=256). ---
    n2, c2 = 600, 128
    s2 = jax.random.normal(k_s, (n2, c2), dtype=jnp.float32)
    w2 = 0.02 * jax.random.normal(k_w, (6, c2), dtype=jnp.float32)
    b2 = 0.01 * jax.random.normal(k_b, (6,), dtype=jnp.float32)
    out2 = jax.block_until_ready(backbone_update(s2, w2, b2, block_rows=256))
    ref2 = s2 @ w2.T + b2
    assert out2.shape == (n2, 6), out2.shape
    assert jnp.allclose(out2, ref2, atol=1e-4, rtol=1e-4), "mismatch (tiled case)"

    # --- Test 3: bf16 compute path (halved HBM read traffic), f32 output. ---
    out3 = jax.block_until_ready(
        backbone_update(s2, w2, b2, block_rows=256, compute_dtype=jnp.bfloat16)
    )
    assert out3.shape == (n2, 6), out3.shape
    assert out3.dtype == jnp.float32, out3.dtype
    assert jnp.allclose(out3, ref2, atol=2e-2, rtol=2e-2), "mismatch (bf16 case)"

    print("KERNEL_OK")
</pallas_src>

<mosaic_0001>
module attributes {stable_mosaic.version = 11 : i64} {
  func.func @_backbone_update_kernel(%arg0: i32, %arg1: memref<16x32xf32, #tpu.memory_space<vmem>>, %arg2: memref<6x32xf32, #tpu.memory_space<vmem>>, %arg3: memref<6x1xf32, #tpu.memory_space<vmem>>, %arg4: memref<6x16xf32, #tpu.memory_space<vmem>>) attributes {dimension_semantics = [#tpu.dimension_semantics<parallel>], iteration_bounds = array<i64: 1>, scalar_prefetch = 0 : i64, scratch_operands = 0 : i64, tpu.core_type = #tpu.core_type<tc>, window_params = [{transform_indices = @transform_0, window_bounds = array<i64: 16, 32>}, {pipeline_mode = #tpu.pipeline_mode<synchronous>, transform_indices = @transform_1, window_bounds = array<i64: 6, 32>}, {pipeline_mode = #tpu.pipeline_mode<synchronous>, transform_indices = @transform_2, window_bounds = array<i64: 6, 1>}, {transform_indices = @transform_3, window_bounds = array<i64: 6, 16>}]} {
    %c0 = arith.constant 0 : index
    %c0_0 = arith.constant 0 : index
    %0 = vector.load %arg2[%c0, %c0_0] : memref<6x32xf32, #tpu.memory_space<vmem>>, vector<6x32xf32>
    %c0_1 = arith.constant 0 : index
    %c0_2 = arith.constant 0 : index
    %1 = vector.load %arg1[%c0_1, %c0_2] : memref<16x32xf32, #tpu.memory_space<vmem>>, vector<16x32xf32>
    %cst = arith.constant dense<0.000000e+00> : vector<6x16xf32>
    %2 = tpu.matmul %0, %1, %cst {dimension_numbers = #tpu.dot_dimension_numbers<[1], [1], [0], [0], [0, 0, 1, 0], [], []>} : vector<6x32xf32>, vector<16x32xf32>, vector<6x16xf32> -> vector<6x16xf32>
    %c0_3 = arith.constant 0 : index
    %c0_4 = arith.constant 0 : index
    %3 = vector.load %arg3[%c0_3, %c0_4] : memref<6x1xf32, #tpu.memory_space<vmem>>, vector<6x1xf32>
    %4 = vector.broadcast %3 : vector<6x1xf32> to vector<6x16xf32>
    %5 = arith.addf %2, %4 : vector<6x16xf32>
    %c0_5 = arith.constant 0 : index
    %c0_6 = arith.constant 0 : index
    %6 = vector.load %arg4[%c0_5, %c0_6] : memref<6x16xf32, #tpu.memory_space<vmem>>, vector<6x16xf32>
    tpu.vector_store %arg4[%c0_5, %c0_6], %5 {strides = array<i32>} : memref<6x16xf32, #tpu.memory_space<vmem>>, vector<6x16xf32>,
    return
  }
  func.func @transform_0(%arg0: i32) -> (i32, i32) {
    %c0_i32 = arith.constant 0 : i32
    %c0_i32_0 = arith.constant 0 : i32
    return %arg0, %c0_i32 : i32, i32
  }
  func.func @transform_1(%arg0: i32) -> (i32, i32) {
    %c0_i32 = arith.constant 0 : i32
    %c0_i32_0 = arith.constant 0 : i32
    %c0_i32_1 = arith.constant 0 : i32
    return %c0_i32, %c0_i32_0 : i32, i32
  }
  func.func @transform_2(%arg0: i32) -> (i32, i32) {
    %c0_i32 = arith.constant 0 : i32
    %c0_i32_0 = arith.constant 0 : i32
    %c0_i32_1 = arith.constant 0 : i32
    return %c0_i32, %c0_i32_0 : i32, i32
  }
  func.func @transform_3(%arg0: i32) -> (i32, i32) {
    %c0_i32 = arith.constant 0 : i32
    %c0_i32_0 = arith.constant 0 : i32
    return %c0_i32, %arg0 : i32, i32
  }
}

</mosaic_0001>

<bundles_post_ra>
// kernel: backbone_update.1
= control target key start
LH: loop header
LB: loop body
LE: loop exit
PB: predicated region body
PF: predicated region fallthrough
CT: control target
= control target key end

     0   :  { %8 = vsyncpa [#allocation3], 0  ;;  %s169_s12 = smov [#allocation2]   ;;  %s218_s0 = inlined_call_operand.vmem [shape: f32[16,32], index: 0, kind: input, shape index: {}]   ;;  %s219_s1 = inlined_call_operand.hbm [shape: f32[6,32], index: 1, kind: input, shape index: {}]   ;;  %s220_s2 = inlined_call_operand.vmem [shape: f32[6,1], index: 2, kind: input, shape index: {}]   ;;  %s221_s3 = inlined_call_operand.vmem [shape: f32[6,16], index: 3, kind: output, shape index: {}]  }
   0x1   :  { %s17_s13 = sshll.u32 %s169_s12, 4  ;;  %s145_s16 = scalar_lea.hbm %s219_s1, 128  ;;  %s18_s13 = int_to_ptr.vmem [resolvable:$true] %s17_s13 }
   0x2   :  { %p146_p0 = scmp.ne.s32.totalorder %s219_s1, %s145_s16  ;;  %p149_p1 = scmp.lt.u32.totalorder %s145_s16, %s219_s1 }
   0x4   :  { %p151_p2 = pnand %p149_p1, %p146_p0 }
   0x6   :  { %154 = shalt.err (!%p151_p2)
}
   0x7   :  { %s155_s21 = scalar_lea.vmem %s18_s13, 128  ;;  %p160_p4 = scmp.lt.s32.totalorder %s18_s13, %s18_s13 }
   0x8   :  { %p156_p3 = scmp.ne.s32.totalorder %s18_s13, %s155_s21  ;;  %p161_p5 = scmp.lt.s32.totalorder %s155_s21, %s155_s21 }
   0xa   :  { %p162_p6 = por %p161_p5, %p160_p4 }
   0xc   :  { %p163_p7 = pnand %p162_p6, %p156_p3 }
   0xe   :  { %166 = shalt.err (!%p163_p7)
}
   0xf   :  { %20 = dma.hbm_to_vmem [thread:$0]  %s219_s1, 128, %s18_s13, [#allocation3]  }
  0x10   :  { %167 = dma.done.wait [#allocation3], 128  }
  0x11   :  { %168 = vsyncadd [#allocation3], 4294967168  ;;  %v170_v0 = vmov 0.0|0.0   ;;  %vm171_vm0 = vmmov 0   ;;  %v172_v1 = vmov 0.0   ;;  %v173_v2 = vmov 0  }
  0x12   :  { %135 = vmatprep.subr.bf16.mxu0 %v170_v0  ;;  %132 = vmatprep.mubr.msk.f32.mxu0 %vm171_vm0, %v172_v1  ;;  %vm35_vm1 = vcmask 261120   ;;  %v27_v3 = vld [vmem:[%s218_s0] sm:$0xff]  ;;  %v28_v4 = vld [vmem:[%s218_s0 + $0x8] sm:$0xff]  ;;  %vm115_vm3 = vcmask 128000  }
  0x13   :  { %144 = vset.pattern.permute.xlu0 %v173_v2  ;;  %vm137_vm2 = vmpackc.low %vm35_vm1, %vm35_vm1  ;;  %v136_v5 = vpack.c.bf16 %v28_v4, %v27_v3  ;;  %v29_v6 = vld [vmem:[%s220_s2] sm:$0x3f] }
  0x14   :  { %32 = vperm.xlu0 %144, %v29_v6   ;;  %v26_v7 = vld [vmem:[#allocation2] sm:$0x3f] }
  0x15   :  { %138 = vmatpush3.bf16.xpose.msk.msra.mxu0 %vm137_vm2, %v136_v5 }
  0x1c   :  { %133 = vmatmul.mubr.msk.f32.vlgmr.msra.gmra.mrb[0].mxu0 %vm35_vm1, %v26_v7 }
  0x93   :  { %v33_v8 = vpop.permute.xlu0 %32 }
  0xef   :  { %v111_v9 = vpop.f32.mrb[0].mxu0 }
  0xf0   :  { %v112_v10 = vadd.f32 %v111_v9, %v33_v8  ;;  %v134_v11 = vpop.f32.mrb[1].mxu0 }
  0xf2   :  { %116 = vst.msk [vmem:[%s221_s3] sm:$0x3f] %vm115_vm3, %v112_v10 }
  0xf3   :  { %121 = vsyncpa [#allocation3], 1 }

</bundles_post_ra>
